<compile_context>
chip_gen: v7x
topology: tpu7x:2x2x1
jax: 0.10.0
libtpu: 0.0.40
codegen_flags: <defaults>
</compile_context>

<pallas_src>
import functools

import jax
import jax.numpy as jnp
from jax.experimental import pallas as pl
from jax.experimental.pallas import tpu as pltpu


def gcn_fused_kernel(a_ref, x_ref, w_ref, aff_ref, o_ref, *, num_layers):
    """Whole GCN stack in one kernel.

    a_ref:   [N, N]              normalized adjacency (VMEM resident across layers)
    x_ref:   [N, C_PAD]          zero-padded input node features
    w_ref:   [L, C_PAD, C_PAD]   zero-padded per-layer dense weights
    aff_ref: [2L, C_PAD]         rows (2l, 2l+1) = folded (scale, shift) of layer l
    o_ref:   [N, C_PAD]          zero-padded output node features
    """
    a = a_ref[...]
    h = x_ref[...]
    # Static Python loop: layer count & shapes are compile-time constants, so the
    # compiler sees the full matmul chain and keeps activations on-chip.
    for l in range(num_layers):
        xw = jnp.dot(h, w_ref[l], preferred_element_type=jnp.float32)   # MXU
        h = jnp.dot(a, xw, preferred_element_type=jnp.float32)          # MXU
        scale = aff_ref[2 * l:2 * l + 1, :]                             # [1, C_PAD]
        shift = aff_ref[2 * l + 1:2 * l + 2, :]                         # [1, C_PAD]
        h = h * scale + shift                                           # VPU (folded BN + bias)
        if l < num_layers - 1:
            h = jnp.maximum(h, 0.0)                                     # ReLU on hidden layers
    o_ref[...] = h


def _pad_to(x, shape):
    return jnp.pad(x, [(0, s - d) for d, s in zip(x.shape, shape)])


def gcn_forward(x, a_norm, params):
    """Runs the full GCN stack in one fused Pallas call. params = list of per-layer dicts."""
    n = a_norm.shape[0]
    num_layers = len(params)
    out_ch = params[-1]["w"].shape[1]
    eps = 1e-5

    # Lane-dense padding of all channel dims.
    c_max = max([x.shape[1]] + [p["w"].shape[1] for p in params])
    c_pad = ((c_max + 127) // 128) * 128

    x_pad = _pad_to(x.astype(jnp.float32), (n, c_pad))
    w_stack = jnp.stack(
        [_pad_to(p["w"].astype(jnp.float32), (c_pad, c_pad)) for p in params]
    )  # [L, C_PAD, C_PAD]

    aff_rows = []
    for i, p in enumerate(params):
        if i == num_layers - 1:
            scale = jnp.ones((p["w"].shape[1],), jnp.float32)
            shift = p["b"]
        else:
            scale = p["gamma"] / jnp.sqrt(p["running_var"] + eps)
            shift = (p["b"] - p["running_mean"]) * scale + p["beta"]
        aff_rows.append(_pad_to(scale[None, :], (1, c_pad)))
        aff_rows.append(_pad_to(shift[None, :], (1, c_pad)))
    aff = jnp.concatenate(aff_rows, axis=0)  # [2L, C_PAD]

    kernel = functools.partial(gcn_fused_kernel, num_layers=num_layers)
    out_pad = pl.pallas_call(
        kernel,
        out_shape=jax.ShapeDtypeStruct((n, c_pad), jnp.float32),
        in_specs=[
            pl.BlockSpec(memory_space=pltpu.MemorySpace.VMEM),  # a_norm
            pl.BlockSpec(memory_space=pltpu.MemorySpace.VMEM),  # x (padded)
            pl.BlockSpec(memory_space=pltpu.MemorySpace.VMEM),  # stacked weights
            pl.BlockSpec(memory_space=pltpu.MemorySpace.VMEM),  # stacked scale/shift
        ],
        out_specs=pl.BlockSpec(memory_space=pltpu.MemorySpace.VMEM),
    )(a_norm.astype(jnp.float32), x_pad, w_stack, aff)

    return out_pad[:, :out_ch]


def gcn_forward_ref(x, a_norm, params):
    """Pure-JAX reference for correctness checking."""
    n_layers = len(params)
    for i, p in enumerate(params):
        last = (i == n_layers - 1)
        h = a_norm @ (x @ p["w"]) + p["b"][None, :]
        if not last:
            eps = 1e-5
            h = (h - p["running_mean"]) / jnp.sqrt(p["running_var"] + eps)
            h = h * p["gamma"] + p["beta"]
            h = jnp.maximum(h, 0.0)
        x = h
    return x


if __name__ == "__main__":
    # Small, module-consistent shapes.
    N = 64            # number of graph nodes
    IN_CH = 16
    HIDDEN = 32
    OUT_CH = 8
    NUM_LAYERS = 3    # convs: in->hid, hid->hid, hid->out ; 2 BN layers
    DROPOUT = 0.5     # unused in eval mode

    key = jax.random.PRNGKey(0)

    # Node features.
    key, kx = jax.random.split(key)
    x = jax.random.normal(kx, (N, IN_CH), dtype=jnp.float32)

    # Dense symmetric adjacency with self-loops, GCN-normalized.
    key, ka = jax.random.split(key)
    A = (jax.random.uniform(ka, (N, N)) < 0.1).astype(jnp.float32)
    A = jnp.minimum(A + A.T, 1.0)
    A = jnp.minimum(A + jnp.eye(N, dtype=jnp.float32), 1.0)
    deg = A.sum(axis=1)
    d_inv_sqrt = 1.0 / jnp.sqrt(deg)
    a_norm = d_inv_sqrt[:, None] * A * d_inv_sqrt[None, :]

    # Deterministic parameter init (synthetic, not a checkpoint load).
    layer_dims = [(IN_CH, HIDDEN)] + [(HIDDEN, HIDDEN)] * (NUM_LAYERS - 2) + [(HIDDEN, OUT_CH)]
    params = []
    for li, (cin, cout) in enumerate(layer_dims):
        key, kw, kb, kg, kbt, km, kv = jax.random.split(key, 7)
        p = {
            "w": jax.random.normal(kw, (cin, cout), jnp.float32) * (1.0 / jnp.sqrt(cin)),
            "b": jax.random.normal(kb, (cout,), jnp.float32) * 0.1,
        }
        if li < NUM_LAYERS - 1:  # BN only on hidden layers
            p["gamma"] = 1.0 + 0.1 * jax.random.normal(kg, (cout,), jnp.float32)
            p["beta"] = 0.1 * jax.random.normal(kbt, (cout,), jnp.float32)
            p["running_mean"] = 0.1 * jax.random.normal(km, (cout,), jnp.float32)
            p["running_var"] = 1.0 + 0.1 * jax.random.uniform(kv, (cout,), jnp.float32)
        params.append(p)

    gcn_jit = jax.jit(gcn_forward)
    out = gcn_jit(x, a_norm, params)
    out = jax.block_until_ready(out)

    ref = gcn_forward_ref(x, a_norm, params)
    assert out.shape == (N, OUT_CH)
    assert jnp.allclose(out, ref, atol=1e-4, rtol=1e-4), "Pallas GCN mismatch vs reference"

    print("KERNEL_OK")
</pallas_src>

<mosaic_0001>
module attributes {stable_mosaic.version = 11 : i64} {
  func.func @gcn_fused_kernel(%arg0: memref<64x64xf32, #tpu.memory_space<vmem>>, %arg1: memref<64x128xf32, #tpu.memory_space<vmem>>, %arg2: memref<3x128x128xf32, #tpu.memory_space<vmem>>, %arg3: memref<6x128xf32, #tpu.memory_space<vmem>>, %arg4: memref<64x128xf32, #tpu.memory_space<vmem>>) attributes {dimension_semantics = [], scalar_prefetch = 0 : i64, scratch_operands = 0 : i64, tpu.core_type = #tpu.core_type<tc>} {
    %c0 = arith.constant 0 : index
    %c0_0 = arith.constant 0 : index
    %0 = vector.load %arg0[%c0, %c0_0] : memref<64x64xf32, #tpu.memory_space<vmem>>, vector<64x64xf32>
    %c0_1 = arith.constant 0 : index
    %c0_2 = arith.constant 0 : index
    %1 = vector.load %arg1[%c0_1, %c0_2] : memref<64x128xf32, #tpu.memory_space<vmem>>, vector<64x128xf32>
    %c0_3 = arith.constant 0 : index
    %c0_4 = arith.constant 0 : index
    %c0_5 = arith.constant 0 : index
    %2 = vector.load %arg2[%c0_3, %c0_4, %c0_5] : memref<3x128x128xf32, #tpu.memory_space<vmem>>, vector<1x128x128xf32>
    %3 = vector.shape_cast %2 : vector<1x128x128xf32> to vector<128x128xf32>
    %cst = arith.constant dense<0.000000e+00> : vector<64x128xf32>
    %4 = tpu.matmul %1, %3, %cst {dimension_numbers = #tpu.dot_dimension_numbers<[1], [0], [0], [1], [0, 0, 1, 1], [], []>} : vector<64x128xf32>, vector<128x128xf32>, vector<64x128xf32> -> vector<64x128xf32>
    %cst_6 = arith.constant dense<0.000000e+00> : vector<64x128xf32>
    %5 = tpu.matmul %0, %4, %cst_6 {dimension_numbers = #tpu.dot_dimension_numbers<[1], [0], [0], [1], [0, 0, 1, 1], [], []>} : vector<64x64xf32>, vector<64x128xf32>, vector<64x128xf32> -> vector<64x128xf32>
    %c0_7 = arith.constant 0 : index
    %c0_8 = arith.constant 0 : index
    %6 = vector.load %arg3[%c0_7, %c0_8] : memref<6x128xf32, #tpu.memory_space<vmem>>, vector<1x128xf32>
    %c1 = arith.constant 1 : index
    %c0_9 = arith.constant 0 : index
    %7 = vector.load %arg3[%c1, %c0_9] : memref<6x128xf32, #tpu.memory_space<vmem>>, vector<1x128xf32>
    %8 = vector.broadcast %6 : vector<1x128xf32> to vector<64x128xf32>
    %9 = arith.mulf %5, %8 : vector<64x128xf32>
    %10 = vector.broadcast %7 : vector<1x128xf32> to vector<64x128xf32>
    %11 = arith.addf %9, %10 : vector<64x128xf32>
    %cst_10 = arith.constant 0.000000e+00 : f32
    %12 = vector.broadcast %cst_10 : f32 to vector<64x128xf32>
    %13 = arith.maximumf %11, %12 : vector<64x128xf32>
    %c1_11 = arith.constant 1 : index
    %c0_12 = arith.constant 0 : index
    %c0_13 = arith.constant 0 : index
    %14 = vector.load %arg2[%c1_11, %c0_12, %c0_13] : memref<3x128x128xf32, #tpu.memory_space<vmem>>, vector<1x128x128xf32>
    %15 = vector.shape_cast %14 : vector<1x128x128xf32> to vector<128x128xf32>
    %cst_14 = arith.constant dense<0.000000e+00> : vector<64x128xf32>
    %16 = tpu.matmul %13, %15, %cst_14 {dimension_numbers = #tpu.dot_dimension_numbers<[1], [0], [0], [1], [0, 0, 1, 1], [], []>} : vector<64x128xf32>, vector<128x128xf32>, vector<64x128xf32> -> vector<64x128xf32>
    %cst_15 = arith.constant dense<0.000000e+00> : vector<64x128xf32>
    %17 = tpu.matmul %0, %16, %cst_15 {dimension_numbers = #tpu.dot_dimension_numbers<[1], [0], [0], [1], [0, 0, 1, 1], [], []>} : vector<64x64xf32>, vector<64x128xf32>, vector<64x128xf32> -> vector<64x128xf32>
    %c2 = arith.constant 2 : index
    %c0_16 = arith.constant 0 : index
    %18 = vector.load %arg3[%c2, %c0_16] : memref<6x128xf32, #tpu.memory_space<vmem>>, vector<1x128xf32>
    %c3 = arith.constant 3 : index
    %c0_17 = arith.constant 0 : index
    %19 = vector.load %arg3[%c3, %c0_17] : memref<6x128xf32, #tpu.memory_space<vmem>>, vector<1x128xf32>
    %20 = vector.broadcast %18 : vector<1x128xf32> to vector<64x128xf32>
    %21 = arith.mulf %17, %20 : vector<64x128xf32>
    %22 = vector.broadcast %19 : vector<1x128xf32> to vector<64x128xf32>
    %23 = arith.addf %21, %22 : vector<64x128xf32>
    %cst_18 = arith.constant 0.000000e+00 : f32
    %24 = vector.broadcast %cst_18 : f32 to vector<64x128xf32>
    %25 = arith.maximumf %23, %24 : vector<64x128xf32>
    %c2_19 = arith.constant 2 : index
    %c0_20 = arith.constant 0 : index
    %c0_21 = arith.constant 0 : index
    %26 = vector.load %arg2[%c2_19, %c0_20, %c0_21] : memref<3x128x128xf32, #tpu.memory_space<vmem>>, vector<1x128x128xf32>
    %27 = vector.shape_cast %26 : vector<1x128x128xf32> to vector<128x128xf32>
    %cst_22 = arith.constant dense<0.000000e+00> : vector<64x128xf32>
    %28 = tpu.matmul %25, %27, %cst_22 {dimension_numbers = #tpu.dot_dimension_numbers<[1], [0], [0], [1], [0, 0, 1, 1], [], []>} : vector<64x128xf32>, vector<128x128xf32>, vector<64x128xf32> -> vector<64x128xf32>
    %cst_23 = arith.constant dense<0.000000e+00> : vector<64x128xf32>
    %29 = tpu.matmul %0, %28, %cst_23 {dimension_numbers = #tpu.dot_dimension_numbers<[1], [0], [0], [1], [0, 0, 1, 1], [], []>} : vector<64x64xf32>, vector<64x128xf32>, vector<64x128xf32> -> vector<64x128xf32>
    %c4 = arith.constant 4 : index
    %c0_24 = arith.constant 0 : index
    %30 = vector.load %arg3[%c4, %c0_24] : memref<6x128xf32, #tpu.memory_space<vmem>>, vector<1x128xf32>
    %c5 = arith.constant 5 : index
    %c0_25 = arith.constant 0 : index
    %31 = vector.load %arg3[%c5, %c0_25] : memref<6x128xf32, #tpu.memory_space<vmem>>, vector<1x128xf32>
    %32 = vector.broadcast %30 : vector<1x128xf32> to vector<64x128xf32>
    %33 = arith.mulf %29, %32 : vector<64x128xf32>
    %34 = vector.broadcast %31 : vector<1x128xf32> to vector<64x128xf32>
    %35 = arith.addf %33, %34 : vector<64x128xf32>
    %c0_26 = arith.constant 0 : index
    %c0_27 = arith.constant 0 : index
    %36 = vector.load %arg4[%c0_26, %c0_27] : memref<64x128xf32, #tpu.memory_space<vmem>>, vector<64x128xf32>
    tpu.vector_store %arg4[%c0_26, %c0_27], %35 {strides = array<i32>} : memref<64x128xf32, #tpu.memory_space<vmem>>, vector<64x128xf32>,
    return
  }
}

</mosaic_0001>

<bundles_post_ra>
// kernel: gcn_forward.1
= control target key start
LH: loop header
LB: loop body
LE: loop exit
PB: predicated region body
PF: predicated region fallthrough
CT: control target
= control target key end

     0   :  { %vm154_vm0 = vcmask 523264   ;;  %s1709_s2 = inlined_call_operand.vmem [shape: f32[3,128,128], index: 2, kind: input, shape index: {}]   ;;  %s1710_s1 = inlined_call_operand.vmem [shape: f32[64,128], index: 1, kind: input, shape index: {}]   ;;  %s1711_s0 = inlined_call_operand.vmem [shape: f32[64,64], index: 0, kind: input, shape index: {}]   ;;  %s1712_s3 = inlined_call_operand.vmem [shape: f32[6,128], index: 3, kind: input, shape index: {}]   ;;  %s1713_s4 = inlined_call_operand.vmem [shape: f32[64,128], index: 4, kind: output, shape index: {}]  }
   0x1   :  { %v33_v0 = vld [vmem:[%s1709_s2] sm:$0xff]  ;;  %v34_v1 = vld [vmem:[%s1709_s2 + $0x8] sm:$0xff]  ;;  %v35_v2 = vld [vmem:[%s1709_s2 + $0x10] sm:$0xff] }
   0x2   :  { %v1242_v3 = vpack.c.bf16 %v34_v1, %v33_v0  ;;  %v36_v4 = vld [vmem:[%s1709_s2 + $0x18] sm:$0xff]  ;;  %v37_v6 = vld [vmem:[%s1709_s2 + $0x20] sm:$0xff]  ;;  %v38_v7 = vld [vmem:[%s1709_s2 + $0x28] sm:$0xff] }
   0x3   :  { %v1246_v5 = vpack.c.bf16 %v36_v4, %v35_v2  ;;  %v1250_v8 = vpack.c.bf16 %v38_v7, %v37_v6  ;;  %v25_v9 = vld [vmem:[%s1710_s1] sm:$0xff]  ;;  %v39_v10 = vld [vmem:[%s1709_s2 + $0x30] sm:$0xff]  ;;  %v40_v11 = vld [vmem:[%s1709_s2 + $0x38] sm:$0xff] }
   0x4   :  { %1243 = vmatprep.subr.bf16.mxu0 %v1242_v3  ;;  %1058 = vmatprep.mubr.f32.mxu0 %v25_v9  ;;  %v1254_v12 = vpack.c.bf16 %v40_v11, %v39_v10  ;;  %v41_v13 = vld [vmem:[%s1709_s2 + $0x40] sm:$0xff]  ;;  %v42_v14 = vld [vmem:[%s1709_s2 + $0x48] sm:$0xff]  ;;  %v43_v16 = vld [vmem:[%s1709_s2 + $0x50] sm:$0xff] }
   0x5   :  { %1245 = vmatpush3.bf16.msra.mxu0 %v1242_v3  ;;  %v1258_v15 = vpack.c.bf16 %v42_v14, %v41_v13  ;;  %v44_v17 = vld [vmem:[%s1709_s2 + $0x58] sm:$0xff]  ;;  %v45_v19 = vld [vmem:[%s1709_s2 + $0x60] sm:$0xff]  ;;  %v46_v20 = vld [vmem:[%s1709_s2 + $0x68] sm:$0xff] }
   0x6   :  { %1247 = vmatprep.subr.bf16.mxu0 %v1246_v5  ;;  %v1262_v18 = vpack.c.bf16 %v44_v17, %v43_v16  ;;  %v1266_v21 = vpack.c.bf16 %v46_v20, %v45_v19  ;;  %v47_v22 = vld [vmem:[%s1709_s2 + $0x70] sm:$0xff]  ;;  %v48_v23 = vld [vmem:[%s1709_s2 + $0x78] sm:$0xff]  ;;  %v26_v25 = vld [vmem:[%s1710_s1 + $0x8] sm:$0xff] }
   0x7   :  { %v1270_v24 = vpack.c.bf16 %v48_v23, %v47_v22  ;;  %v27_v26 = vld [vmem:[%s1710_s1 + $0x10] sm:$0xff]  ;;  %v28_v27 = vld [vmem:[%s1710_s1 + $0x18] sm:$0xff]  ;;  %v29_v28 = vld [vmem:[%s1710_s1 + $0x20] sm:$0xff] }
   0x8   :  { %v30_v29 = vld [vmem:[%s1710_s1 + $0x28] sm:$0xff]  ;;  %v31_v30 = vld [vmem:[%s1710_s1 + $0x30] sm:$0xff]  ;;  %v32_v31 = vld [vmem:[%s1710_s1 + $0x38] sm:$0xff] }
   0x9   :  { %1249 = vmatpush3.bf16.msra.mxu0 %v1246_v5  ;;  %v1486_v32 = vld [vmem:[%s1711_s0] sm:$0xff]  ;;  %v855_v43 = vld [vmem:[%s1709_s2 + $0x88] sm:$0xff]  ;;  %v856_v48 = vld [vmem:[%s1709_s2 + $0x90] sm:$0xff] }
   0xa   :  { %1251 = vmatprep.subr.bf16.mxu0 %v1250_v8  ;;  %1086 = vmatprep.mubr.msk.f32.mxu1 %vm154_vm0, %v1486_v32  ;;  %v854_v42 = vld [vmem:[%s1709_s2 + $0x80] sm:$0xff]  ;;  %v857_v49 = vld [vmem:[%s1709_s2 + $0x98] sm:$0xff]  ;;  %v1507_v50 = vld [vmem:[%s1711_s0 + $0x8] sm:$0xff] }
   0xb   :  { %v1290_v47 = vpack.c.bf16 %v855_v43, %v854_v42  ;;  %v1512_v51 = vld [vmem:[%s1711_s0 + $0x10] sm:$0xff]  ;;  %v1294_v52 = vpack.c.bf16 %v857_v49, %v856_v48  ;;  %v858_v53 = vld [vmem:[%s1709_s2 + $0xa0] sm:$0xff]  ;;  %v859_v54 = vld [vmem:[%s1709_s2 + $0xa8] sm:$0xff] }
   0xc   :  { %v1527_v55 = vld [vmem:[%s1711_s0 + $0x18] sm:$0xff]  ;;  %v1532_v56 = vld [vmem:[%s1711_s0 + $0x20] sm:$0xff]  ;;  %v1298_v57 = vpack.c.bf16 %v859_v54, %v858_v53  ;;  %v860_v58 = vld [vmem:[%s1709_s2 + $0xb0] sm:$0xff] }
   0xd   :  { %1253 = vmatpush3.bf16.msra.mxu0 %v1250_v8  ;;  %v861_v59 = vld [vmem:[%s1709_s2 + $0xb8] sm:$0xff]  ;;  %v1547_v60 = vld [vmem:[%s1711_s0 + $0x28] sm:$0xff]  ;;  %v1552_v61 = vld [vmem:[%s1711_s0 + $0x30] sm:$0xff] }
   0xe   :  { %1255 = vmatprep.subr.bf16.mxu0 %v1254_v12  ;;  %v1302_v62 = vpack.c.bf16 %v861_v59, %v860_v58  ;;  %v862_v63 = vld [vmem:[%s1709_s2 + $0xc0] sm:$0xff]  ;;  %v863_v0 = vld [vmem:[%s1709_s2 + $0xc8] sm:$0xff]  ;;  %v1567_v1 = vld [vmem:[%s1711_s0 + $0x38] sm:$0xff] }
   0xf   :  { %v1306_v2 = vpack.c.bf16 %v863_v0, %v862_v63  ;;  %v864_v3 = vld [vmem:[%s1709_s2 + $0xd0] sm:$0xff]  ;;  %v865_v4 = vld [vmem:[%s1709_s2 + $0xd8] sm:$0xff]  ;;  %v866_v6 = vld [vmem:[%s1709_s2 + $0xe0] sm:$0xff] }
  0x10   :  { %v1310_v5 = vpack.c.bf16 %v865_v4, %v864_v3  ;;  %v867_v7 = vld [vmem:[%s1709_s2 + $0xe8] sm:$0xff]  ;;  %v868_v9 = vld [vmem:[%s1709_s2 + $0xf0] sm:$0xff]  ;;  %v869_v10 = vld [vmem:[%s1709_s2 + $0xf8] sm:$0xff] }
  0x11   :  { %1257 = vmatpush3.bf16.msra.mxu0 %v1254_v12  ;;  %v1314_v8 = vpack.c.bf16 %v867_v7, %v866_v6  ;;  %v1318_v11 = vpack.c.bf16 %v869_v10, %v868_v9  ;;  %v852_v12 = vld [vmem:[%s1712_s3] ss:$0 sm:$0xff]  ;;  %v853_v14 = vld [vmem:[%s1712_s3 + $0x1] ss:$0 sm:$0xff]  ;;  %v882_v4 = vld [vmem:[%s1709_s2 + $0x110] sm:$0xff] }
  0x12   :  { %1259 = vmatprep.subr.bf16.mxu0 %v1258_v15  ;;  %v884_v7 = vld [vmem:[%s1709_s2 + $0x120] sm:$0xff]  ;;  %v886_v10 = vld [vmem:[%s1709_s2 + $0x130] sm:$0xff] }
  0x15   :  { %1261 = vmatpush3.bf16.msra.mxu0 %v1258_v15 }
  0x16   :  { %1263 = vmatprep.subr.bf16.mxu0 %v1262_v18 }
  0x19   :  { %1265 = vmatpush3.bf16.msra.mxu0 %v1262_v18 }
  0x1a   :  { %1267 = vmatprep.subr.bf16.mxu0 %v1266_v21 }
  0x1d   :  { %1269 = vmatpush3.bf16.msra.mxu0 %v1266_v21 }
  0x1e   :  { %1271 = vmatprep.subr.bf16.mxu0 %v1270_v24 }
  0x21   :  { %1273 = vmatpush3.bf16.msra.mxu0 %v1270_v24 }
  0x24   :  { %1059 = vmatmul.mubr.f32.vlgmr.msra.gmra.mrb[0].mxu0 %v26_v25 }
  0x25   :  { %1061 = vmatprep.mubr.f32.mxu0 %v27_v26 }
  0x28   :  { %1062 = vmatmul.mubr.f32.gmra.mrb[2].mxu0 %v28_v27 }
  0x29   :  { %1064 = vmatprep.mubr.f32.mxu0 %v29_v28 }
  0x2c   :  { %1065 = vmatmul.mubr.f32.gmra.mrb[4].mxu0 %v30_v29 }
  0x2d   :  { %1067 = vmatprep.mubr.f32.mxu0 %v31_v30 }
  0x30   :  { %1068 = vmatmul.mubr.f32.gmra.mrb[6].mxu0 %v32_v31 }
  0x31   :  { %1158 = vmatprep.mubr.msk.f32.mxu0 %vm154_vm0, %v1486_v32 }
  0xf7   :  { %v1060_v33 = vpop.f32.mrb[0].mxu0 }
  0xf8   :  { %v115_v34 = vpop.f32.mrb[1].mxu0 }
  0xf9   :  { %v1274_v35 = vpack.c.bf16 %v1060_v33, %v115_v34 }
  0xfb   :  { %v1063_v36 = vpop.f32.mrb[2].mxu0  ;;  %1275 = vmatprep.subr.bf16.mxu1 %v1274_v35 }
  0xfc   :  { %v125_v37 = vpop.f32.mrb[3].mxu0  ;;  %1277 = vmatpush3.bf16.msra.mxu1 %v1274_v35 }
  0xfd   :  { %v1278_v38 = vpack.c.bf16 %v1063_v36, %v125_v37 }
  0xff   :  { %v1066_v39 = vpop.f32.mrb[4].mxu0  ;;  %1279 = vmatprep.subr.bf16.mxu1 %v1278_v38 }
 0x100   :  { %v135_v40 = vpop.f32.mrb[5].mxu0  ;;  %1281 = vmatpush3.bf16.msra.mxu1 %v1278_v38 }
 0x101   :  { %v1282_v41 = vpack.c.bf16 %v1066_v39, %v135_v40 }
 0x103   :  { %v1069_v44 = vpop.f32.mrb[6].mxu0  ;;  %1283 = vmatprep.subr.bf16.mxu1 %v1282_v41 }
 0x104   :  { %v145_v45 = vpop.f32.mrb[7].mxu0  ;;  %1285 = vmatpush3.bf16.msra.mxu1 %v1282_v41 }
 0x105   :  { %v1286_v46 = vpack.c.bf16 %v1069_v44, %v145_v45 }
 0x107   :  { %1287 = vmatprep.subr.bf16.mxu1 %v1286_v46 }
 0x108   :  { %1289 = vmatpush3.bf16.msra.mxu1 %v1286_v46 }
 0x109   :  { %1291 = vmatprep.subr.bf16.mxu1 %v1290_v47 }
 0x10b   :  { %1087 = vmatmul.mubr.msk.f32.vlgmr.msra.gmra.mrb[0].mxu1 %vm154_vm0, %v1507_v50 }
 0x10c   :  { %1089 = vmatprep.mubr.msk.f32.mxu1 %vm154_vm0, %v1512_v51  ;;  %1293 = vmatpush3.bf16.msra.mxu1 %v1290_v47 }
 0x10d   :  { %1295 = vmatprep.subr.bf16.mxu1 %v1294_v52 }
 0x10f   :  { %1090 = vmatmul.mubr.msk.f32.gmra.mrb[2].mxu1 %vm154_vm0, %v1527_v55 }
 0x110   :  { %1092 = vmatprep.mubr.msk.f32.mxu1 %vm154_vm0, %v1532_v56  ;;  %1297 = vmatpush3.bf16.msra.mxu1 %v1294_v52 }
 0x111   :  { %1299 = vmatprep.subr.bf16.mxu1 %v1298_v57 }
 0x113   :  { %1093 = vmatmul.mubr.msk.f32.gmra.mrb[4].mxu1 %vm154_vm0, %v1547_v60 }
 0x114   :  { %1095 = vmatprep.mubr.msk.f32.mxu1 %vm154_vm0, %v1552_v61  ;;  %1301 = vmatpush3.bf16.msra.mxu1 %v1298_v57 }
 0x115   :  { %1303 = vmatprep.subr.bf16.mxu1 %v1302_v62 }
 0x117   :  { %1096 = vmatmul.mubr.msk.f32.gmra.mrb[6].mxu1 %vm154_vm0, %v1567_v1 }
 0x118   :  { %1305 = vmatpush3.bf16.msra.mxu1 %v1302_v62  ;;  %v880_v62 = vld [vmem:[%s1709_s2 + $0x100] sm:$0xff] }
 0x119   :  { %1307 = vmatprep.subr.bf16.mxu1 %v1306_v2 }
 0x11c   :  { %1309 = vmatpush3.bf16.msra.mxu1 %v1306_v2 }
 0x11d   :  { %1311 = vmatprep.subr.bf16.mxu1 %v1310_v5 }
 0x120   :  { %1313 = vmatpush3.bf16.msra.mxu1 %v1310_v5  ;;  %v883_v5 = vld [vmem:[%s1709_s2 + $0x118] sm:$0xff] }
 0x121   :  { %1315 = vmatprep.subr.bf16.mxu1 %v1314_v8  ;;  %v1342_v6 = vpack.c.bf16 %v883_v5, %v882_v4 }
 0x124   :  { %1317 = vmatpush3.bf16.msra.mxu1 %v1314_v8  ;;  %v885_v8 = vld [vmem:[%s1709_s2 + $0x128] sm:$0xff] }
 0x125   :  { %1319 = vmatprep.subr.bf16.mxu1 %v1318_v11  ;;  %v1346_v9 = vpack.c.bf16 %v885_v8, %v884_v7 }
 0x128   :  { %1321 = vmatpush3.bf16.msra.mxu1 %v1318_v11  ;;  %v887_v11 = vld [vmem:[%s1709_s2 + $0x138] sm:$0xff] }
 0x1de   :  { %v1088_v13 = vpop.f32.mrb[0].mxu1 }
 0x1df   :  { %v291_v15 = vmul.f32 %v1088_v13, %v852_v12  ;;  %v245_v16 = vpop.f32.mrb[1].mxu1  ;;  %v888_v13 = vld [vmem:[%s1709_s2 + $0x140] sm:$0xff] }
 0x1e0   :  { %v290_v17 = vmul.f32 %v852_v12, %v245_v16  ;;  %v890_v16 = vld [vmem:[%s1709_s2 + $0x150] sm:$0xff] }
 0x1e1   :  { %v303_v18 = vadd.f32 %v853_v14, %v291_v15 }
 0x1e2   :  { %v302_v19 = vadd.f32 %v853_v14, %v290_v17  ;;  %v1091_v20 = vpop.f32.mrb[2].mxu1  ;;  %v891_v17 = vld [vmem:[%s1709_s2 + $0x158] sm:$0xff] }
 0x1e3   :  { %v293_v21 = vmul.f32 %v1091_v20, %v852_v12  ;;  %v255_v22 = vpop.f32.mrb[3].mxu1  ;;  %v311_v25 = vmax.f32 %v303_v18, 0.0  ;;  %v1358_v18 = vpack.c.bf16 %v891_v17, %v890_v16  ;;  %v893_v20 = vld [vmem:[%s1709_s2 + $0x168] sm:$0xff] }
 0x1e4   :  { %v310_v23 = vmax.f32 %v302_v19, 0.0  ;;  %v292_v24 = vmul.f32 %v852_v12, %v255_v22  ;;  %v892_v19 = vld [vmem:[%s1709_s2 + $0x160] sm:$0xff]  ;;  %v894_v22 = vld [vmem:[%s1709_s2 + $0x170] sm:$0xff] }
 0x1e5   :  { %v305_v26 = vadd.f32 %v853_v14, %v293_v21  ;;  %v1362_v21 = vpack.c.bf16 %v893_v20, %v892_v19 }
 0x1e6   :  { %v304_v27 = vadd.f32 %v853_v14, %v292_v24  ;;  %v1094_v28 = vpop.f32.mrb[4].mxu1  ;;  %1130 = vmatprep.mubr.f32.mxu1 %v310_v23  ;;  %v895_v23 = vld [vmem:[%s1709_s2 + $0x178] sm:$0xff] }
 0x1e7   :  { %v295_v29 = vmul.f32 %v1094_v28, %v852_v12  ;;  %v265_v30 = vpop.f32.mrb[5].mxu1  ;;  %1131 = vmatmul.mubr.f32.vlgmr.msra.gmra.mrb[8].mxu1 %v311_v25  ;;  %v313_v34 = vmax.f32 %v305_v26, 0.0  ;;  %v1366_v24 = vpack.c.bf16 %v895_v23, %v894_v22  ;;  %v878_v25 = vld [vmem:[%s1712_s3 + $0x2] ss:$0 sm:$0xff] }
 0x1e8   :  { %v312_v31 = vmax.f32 %v304_v27, 0.0  ;;  %v294_v33 = vmul.f32 %v852_v12, %v265_v30  ;;  %v879_v27 = vld [vmem:[%s1712_s3 + $0x3] ss:$0 sm:$0xff] }
 0x1e9   :  { %v307_v35 = vadd.f32 %v853_v14, %v295_v29 }
 0x1ea   :  { %v306_v36 = vadd.f32 %v853_v14, %v294_v33  ;;  %v1097_v37 = vpop.f32.mrb[6].mxu1  ;;  %1133 = vmatprep.mubr.f32.mxu1 %v312_v31 }
 0x1eb   :  { %v297_v38 = vmul.f32 %v1097_v37, %v852_v12  ;;  %v275_v39 = vpop.f32.mrb[7].mxu1  ;;  %1134 = vmatmul.mubr.f32.gmra.mrb[10].mxu1 %v313_v34  ;;  %v315_v42 = vmax.f32 %v307_v35, 0.0 }
 0x1ec   :  { %v314_v40 = vmax.f32 %v306_v36, 0.0  ;;  %v296_v41 = vmul.f32 %v852_v12, %v275_v39  ;;  %v1350_v12 = vpack.c.bf16 %v887_v11, %v886_v10 }
 0x1ed   :  { %v309_v43 = vadd.f32 %v853_v14, %v297_v38 }
 0x1ee   :  { %v308_v44 = vadd.f32 %v853_v14, %v296_v41  ;;  %1136 = vmatprep.mubr.f32.mxu1 %v314_v40  ;;  %v889_v14 = vld [vmem:[%s1709_s2 + $0x148] sm:$0xff] }
 0x1ef   :  { %1137 = vmatmul.mubr.f32.gmra.mrb[12].mxu1 %v315_v42  ;;  %v317_v46 = vmax.f32 %v309_v43, 0.0  ;;  %v1354_v15 = vpack.c.bf16 %v889_v14, %v888_v13 }
 0x1f0   :  { %v316_v45 = vmax.f32 %v308_v44, 0.0 }
 0x1f2   :  { %1139 = vmatprep.mubr.f32.mxu1 %v316_v45 }
 0x1f3   :  { %1140 = vmatmul.mubr.f32.gmra.mrb[14].mxu1 %v317_v46 }
 0x1f4   :  { %1230 = vmatprep.mubr.msk.f32.mxu1 %vm154_vm0, %v1486_v32  ;;  %v881_v32 = vld [vmem:[%s1709_s2 + $0x108] sm:$0xff] }
 0x1f5   :  { %v1338_v3 = vpack.c.bf16 %v881_v32, %v880_v62 }
 0x2ba   :  { %v1132_v47 = vpop.f32.mrb[8].mxu1 }
 0x2bb   :  { %v401_v48 = vpop.f32.mrb[9].mxu1 }
 0x2bc   :  { %v1322_v49 = vpack.c.bf16 %v1132_v47, %v401_v48 }
 0x2be   :  { %v1135_v52 = vpop.f32.mrb[10].mxu1  ;;  %1323 = vmatprep.subr.bf16.mxu0 %v1322_v49 }
 0x2bf   :  { %v411_v53 = vpop.f32.mrb[11].mxu1  ;;  %1325 = vmatpush3.bf16.msra.mxu0 %v1322_v49 }
 0x2c0   :  { %v1326_v54 = vpack.c.bf16 %v1135_v52, %v411_v53 }
 0x2c2   :  { %v1138_v57 = vpop.f32.mrb[12].mxu1  ;;  %1327 = vmatprep.subr.bf16.mxu0 %v1326_v54 }
 0x2c3   :  { %v421_v58 = vpop.f32.mrb[13].mxu1  ;;  %1329 = vmatpush3.bf16.msra.mxu0 %v1326_v54 }
 0x2c4   :  { %v1330_v59 = vpack.c.bf16 %v1138_v57, %v421_v58 }
 0x2c6   :  { %v1141_v63 = vpop.f32.mrb[14].mxu1  ;;  %1331 = vmatprep.subr.bf16.mxu0 %v1330_v59 }
 0x2c7   :  { %v431_v0 = vpop.f32.mrb[15].mxu1  ;;  %1333 = vmatpush3.bf16.msra.mxu0 %v1330_v59 }
 0x2c8   :  { %v1334_v2 = vpack.c.bf16 %v1141_v63, %v431_v0 }
 0x2ca   :  { %1335 = vmatprep.subr.bf16.mxu0 %v1334_v2 }
 0x2cb   :  { %1337 = vmatpush3.bf16.msra.mxu0 %v1334_v2 }
 0x2cc   :  { %1339 = vmatprep.subr.bf16.mxu0 %v1338_v3 }
 0x2ce   :  { %1159 = vmatmul.mubr.msk.f32.vlgmr.msra.gmra.mrb[8].mxu0 %vm154_vm0, %v1507_v50 }
 0x2cf   :  { %1161 = vmatprep.mubr.msk.f32.mxu0 %vm154_vm0, %v1512_v51  ;;  %1341 = vmatpush3.bf16.msra.mxu0 %v1338_v3 }
 0x2d0   :  { %1343 = vmatprep.subr.bf16.mxu0 %v1342_v6 }
 0x2d2   :  { %1162 = vmatmul.mubr.msk.f32.gmra.mrb[10].mxu0 %vm154_vm0, %v1527_v55 }
 0x2d3   :  { %1164 = vmatprep.mubr.msk.f32.mxu0 %vm154_vm0, %v1532_v56  ;;  %1345 = vmatpush3.bf16.msra.mxu0 %v1342_v6 }
 0x2d4   :  { %1347 = vmatprep.subr.bf16.mxu0 %v1346_v9 }
 0x2d6   :  { %1165 = vmatmul.mubr.msk.f32.gmra.mrb[12].mxu0 %vm154_vm0, %v1547_v60 }
 0x2d7   :  { %1167 = vmatprep.mubr.msk.f32.mxu0 %vm154_vm0, %v1552_v61  ;;  %1349 = vmatpush3.bf16.msra.mxu0 %v1346_v9 }
 0x2d8   :  { %1351 = vmatprep.subr.bf16.mxu0 %v1350_v12 }
 0x2da   :  { %1168 = vmatmul.mubr.msk.f32.gmra.mrb[14].mxu0 %vm154_vm0, %v1567_v1 }
 0x2db   :  { %1353 = vmatpush3.bf16.msra.mxu0 %v1350_v12 }
 0x2dc   :  { %1355 = vmatprep.subr.bf16.mxu0 %v1354_v15 }
 0x2df   :  { %1357 = vmatpush3.bf16.msra.mxu0 %v1354_v15 }
 0x2e0   :  { %1359 = vmatprep.subr.bf16.mxu0 %v1358_v18 }
 0x2e3   :  { %1361 = vmatpush3.bf16.msra.mxu0 %v1358_v18 }
 0x2e4   :  { %1363 = vmatprep.subr.bf16.mxu0 %v1362_v21 }
 0x2e7   :  { %1365 = vmatpush3.bf16.msra.mxu0 %v1362_v21 }
 0x2e8   :  { %1367 = vmatprep.subr.bf16.mxu0 %v1366_v24 }
 0x2eb   :  { %1369 = vmatpush3.bf16.msra.mxu0 %v1366_v24 }
 0x3a1   :  { %v1160_v26 = vpop.f32.mrb[8].mxu0 }
 0x3a2   :  { %v552_v28 = vmul.f32 %v1160_v26, %v878_v25  ;;  %v506_v29 = vpop.f32.mrb[9].mxu0 }
 0x3a3   :  { %v551_v30 = vmul.f32 %v878_v25, %v506_v29 }
 0x3a4   :  { %v564_v31 = vadd.f32 %v879_v27, %v552_v28 }
 0x3a5   :  { %v563_v33 = vadd.f32 %v879_v27, %v551_v30  ;;  %v1163_v34 = vpop.f32.mrb[10].mxu0 }
 0x3a6   :  { %v554_v35 = vmul.f32 %v1163_v34, %v878_v25  ;;  %v516_v36 = vpop.f32.mrb[11].mxu0  ;;  %v572_v39 = vmax.f32 %v564_v31, 0.0 }
 0x3a7   :  { %v571_v37 = vmax.f32 %v563_v33, 0.0  ;;  %v553_v38 = vmul.f32 %v878_v25, %v516_v36 }
 0x3a8   :  { %v566_v40 = vadd.f32 %v879_v27, %v554_v35 }
 0x3a9   :  { %v565_v41 = vadd.f32 %v879_v27, %v553_v38  ;;  %v1166_v42 = vpop.f32.mrb[12].mxu0  ;;  %1202 = vmatprep.mubr.f32.mxu0 %v571_v37 }
 0x3aa   :  { %v556_v43 = vmul.f32 %v1166_v42, %v878_v25  ;;  %v526_v44 = vpop.f32.mrb[13].mxu0  ;;  %1203 = vmatmul.mubr.f32.vlgmr.msra.gmra.mrb[16].mxu0 %v572_v39  ;;  %v574_v47 = vmax.f32 %v566_v40, 0.0 }
 0x3ab   :  { %v573_v45 = vmax.f32 %v565_v41, 0.0  ;;  %v555_v46 = vmul.f32 %v878_v25, %v526_v44 }
 0x3ac   :  { %v568_v48 = vadd.f32 %v879_v27, %v556_v43 }
 0x3ad   :  { %v567_v49 = vadd.f32 %v879_v27, %v555_v46  ;;  %v1169_v52 = vpop.f32.mrb[14].mxu0  ;;  %1205 = vmatprep.mubr.f32.mxu0 %v573_v45 }
 0x3ae   :  { %v558_v53 = vmul.f32 %v1169_v52, %v878_v25  ;;  %v536_v54 = vpop.f32.mrb[15].mxu0  ;;  %1206 = vmatmul.mubr.f32.gmra.mrb[18].mxu0 %v574_v47  ;;  %v576_v59 = vmax.f32 %v568_v48, 0.0 }
 0x3af   :  { %v575_v57 = vmax.f32 %v567_v49, 0.0  ;;  %v557_v58 = vmul.f32 %v878_v25, %v536_v54 }
 0x3b0   :  { %v570_v62 = vadd.f32 %v879_v27, %v558_v53 }
 0x3b1   :  { %v569_v32 = vadd.f32 %v879_v27, %v557_v58  ;;  %1208 = vmatprep.mubr.f32.mxu0 %v575_v57 }
 0x3b2   :  { %1209 = vmatmul.mubr.f32.gmra.mrb[20].mxu0 %v576_v59  ;;  %v578_v0 = vmax.f32 %v570_v62, 0.0 }
 0x3b3   :  { %v577_v63 = vmax.f32 %v569_v32, 0.0 }
 0x3b5   :  { %1211 = vmatprep.mubr.f32.mxu0 %v577_v63 }
 0x3b6   :  { %1212 = vmatmul.mubr.f32.gmra.mrb[22].mxu0 %v578_v0 }
 0x47d   :  { %v1204_v2 = vpop.f32.mrb[16].mxu0 }
 0x47e   :  { %v662_v3 = vpop.f32.mrb[17].mxu0 }
 0x47f   :  { %v1370_v4 = vpack.c.bf16 %v1204_v2, %v662_v3 }
 0x481   :  { %v1207_v5 = vpop.f32.mrb[18].mxu0  ;;  %1371 = vmatprep.subr.bf16.mxu1 %v1370_v4 }
 0x482   :  { %v672_v6 = vpop.f32.mrb[19].mxu0  ;;  %1373 = vmatpush3.bf16.msra.mxu1 %v1370_v4 }
 0x483   :  { %v1374_v7 = vpack.c.bf16 %v1207_v5, %v672_v6 }
 0x485   :  { %v1210_v8 = vpop.f32.mrb[20].mxu0  ;;  %1375 = vmatprep.subr.bf16.mxu1 %v1374_v7 }
 0x486   :  { %v682_v9 = vpop.f32.mrb[21].mxu0  ;;  %1377 = vmatpush3.bf16.msra.mxu1 %v1374_v7 }
 0x487   :  { %v1378_v10 = vpack.c.bf16 %v1210_v8, %v682_v9 }
 0x489   :  { %v1213_v11 = vpop.f32.mrb[22].mxu0  ;;  %1379 = vmatprep.subr.bf16.mxu1 %v1378_v10 }
 0x48a   :  { %v692_v12 = vpop.f32.mrb[23].mxu0  ;;  %1381 = vmatpush3.bf16.msra.mxu1 %v1378_v10 }
 0x48b   :  { %v1382_v13 = vpack.c.bf16 %v1213_v11, %v692_v12 }
 0x48d   :  { %1383 = vmatprep.subr.bf16.mxu1 %v1382_v13 }
 0x48e   :  { %1385 = vmatpush3.bf16.msra.mxu1 %v1382_v13 }
 0x491   :  { %1231 = vmatmul.mubr.msk.f32.vlgmr.msra.gmra.mrb[16].mxu1 %vm154_vm0, %v1507_v50  ;;  %v904_v50 = vld [vmem:[%s1712_s3 + $0x4] ss:$0 sm:$0xff] }
 0x492   :  { %1233 = vmatprep.mubr.msk.f32.mxu1 %vm154_vm0, %v1512_v51 }
 0x495   :  { %1234 = vmatmul.mubr.msk.f32.gmra.mrb[18].mxu1 %vm154_vm0, %v1527_v55  ;;  %v905_v55 = vld [vmem:[%s1712_s3 + $0x5] ss:$0 sm:$0xff] }
 0x496   :  { %1236 = vmatprep.mubr.msk.f32.mxu1 %vm154_vm0, %v1532_v56 }
 0x499   :  { %1237 = vmatmul.mubr.msk.f32.gmra.mrb[20].mxu1 %vm154_vm0, %v1547_v60 }
 0x49a   :  { %1239 = vmatprep.mubr.msk.f32.mxu1 %vm154_vm0, %v1552_v61 }
 0x49d   :  { %1240 = vmatmul.mubr.msk.f32.gmra.mrb[22].mxu1 %vm154_vm0, %v1567_v1 }
 0x564   :  { %v1232_v51 = vpop.f32.mrb[16].mxu1 }
 0x565   :  { %v813_v14 = vmul.f32 %v1232_v51, %v904_v50  ;;  %v767_v56 = vpop.f32.mrb[17].mxu1 }
 0x566   :  { %v812_v15 = vmul.f32 %v904_v50, %v767_v56 }
 0x567   :  { %v825_v16 = vadd.f32 %v905_v55, %v813_v14 }
 0x568   :  { %v824_v60 = vadd.f32 %v905_v55, %v812_v15  ;;  %v1235_v17 = vpop.f32.mrb[18].mxu1 }
 0x569   :  { %833 = vst [vmem:[%s1713_s4 + $0x8] sm:$0xff] %v825_v16  ;;  %v815_v61 = vmul.f32 %v1235_v17, %v904_v50  ;;  %v777_v1 = vpop.f32.mrb[19].mxu1 }
 0x56a   :  { %832 = vst [vmem:[%s1713_s4] sm:$0xff] %v824_v60  ;;  %v814_v18 = vmul.f32 %v904_v50, %v777_v1 }
 0x56b   :  { %v827_v19 = vadd.f32 %v905_v55, %v815_v61 }
 0x56c   :  { %v826_v20 = vadd.f32 %v905_v55, %v814_v18  ;;  %v1238_v21 = vpop.f32.mrb[20].mxu1 }
 0x56d   :  { %835 = vst [vmem:[%s1713_s4 + $0x18] sm:$0xff] %v827_v19  ;;  %v817_v22 = vmul.f32 %v1238_v21, %v904_v50  ;;  %v787_v23 = vpop.f32.mrb[21].mxu1 }
 0x56e   :  { %834 = vst [vmem:[%s1713_s4 + $0x10] sm:$0xff] %v826_v20  ;;  %v816_v24 = vmul.f32 %v904_v50, %v787_v23 }
 0x56f   :  { %v829_v25 = vadd.f32 %v905_v55, %v817_v22 }
 0x570   :  { %v828_v26 = vadd.f32 %v905_v55, %v816_v24  ;;  %v1241_v27 = vpop.f32.mrb[22].mxu1 }
 0x571   :  { %837 = vst [vmem:[%s1713_s4 + $0x28] sm:$0xff] %v829_v25  ;;  %v819_v28 = vmul.f32 %v1241_v27, %v904_v50  ;;  %v797_v29 = vpop.f32.mrb[23].mxu1 }
 0x572   :  { %836 = vst [vmem:[%s1713_s4 + $0x20] sm:$0xff] %v828_v26  ;;  %v818_v30 = vmul.f32 %v904_v50, %v797_v29 }
 0x573   :  { %v831_v31 = vadd.f32 %v905_v55, %v819_v28 }
 0x574   :  { %v830_v33 = vadd.f32 %v905_v55, %v818_v30 }
 0x575   :  { %839 = vst [vmem:[%s1713_s4 + $0x38] sm:$0xff] %v831_v31 }
 0x576   :  { %838 = vst [vmem:[%s1713_s4 + $0x30] sm:$0xff] %v830_v33 }

</bundles_post_ra>
